<compile_context>
chip_gen: v5e
topology: v5e:2x2
jax: 0.10.0
libtpu: 0.0.40
codegen_flags: <defaults>
</compile_context>

<pallas_src>
import jax
import jax.numpy as jnp
from jax.experimental import pallas as pl
from jax.experimental.pallas import tpu as pltpu


NEG_SLOPE = 0.01          # F.leaky_relu default negative_slope
K_IN = 28 * 28            # 784 contraction dim for fc1 (full-dim block, no padding)
N_PAD = 128               # lane-dense padded classifier output width


def _round_up(x, m):
    return ((x + m - 1) // m) * m


def _leaky_relu(x):
    return jnp.where(x > 0, x, NEG_SLOPE * x)


def mlp_kernel(x_ref, w1_ref, b1_ref, w2_ref, b2_ref, w3_ref, b3_ref, o_ref):
    # fc1: cast the f32 x tile to bf16 right at the MXU input; accumulate in f32.
    x_bf = x_ref[...].astype(jnp.bfloat16)
    h = jnp.dot(x_bf, w1_ref[...], preferred_element_type=jnp.float32)
    h = _leaky_relu(h + b1_ref[...])
    # fc2
    h = jnp.dot(h.astype(jnp.bfloat16), w2_ref[...],
                preferred_element_type=jnp.float32)
    h = _leaky_relu(h + b2_ref[...])
    # fc3 (no activation); output is a lane-dense 128-wide f32 slab.
    h = jnp.dot(h.astype(jnp.bfloat16), w3_ref[...],
                preferred_element_type=jnp.float32)
    o_ref[...] = (h + b3_ref[...]).astype(o_ref.dtype)


def mlp_forward(x, params, *, tb_max=2048):
    """x: [B, 1, 28, 28] (NCHW) float32 -> [B, n_class] float32."""
    w1, b1, w2, b2, w3, b3 = params          # W stored as (in, out) == torch_W.T
    B = x.shape[0]
    H1 = w1.shape[1]
    H2 = w2.shape[1]
    n_class = w3.shape[1]

    x2d = x.reshape(B, -1).astype(jnp.float32)   # torch.flatten(x, start_dim=1)
    K = x2d.shape[1]
    assert K == K_IN and w1.shape[0] == K_IN

    # Row tile: multiple of 8; at least 2 grid steps when B > 8 (both v7x TCs busy);
    # capped at tb_max so the double-buffered f32 x tile fits the per-core VMEM budget.
    TB = max(8, min(tb_max, _round_up(pl.cdiv(B, 2), 8)))
    # Pad the batch only to a sublane multiple (cheap, <= 7 rows); the ragged last
    # grid block (when TB does not divide B_pad) is masked by Pallas.
    B_pad = _round_up(B, 8)
    if B_pad != B:
        x2d = jnp.pad(x2d, ((0, B_pad - B), (0, 0)))
    grid = (pl.cdiv(B_pad, TB),)

    # ---- weights/biases: cast once, small zero-pads only on the tiny fc3 ----
    w1_b = w1.astype(jnp.bfloat16)                                   # (784, H1)
    w2_b = w2.astype(jnp.bfloat16)                                   # (H1, H2)
    w3_b = jnp.zeros((H2, N_PAD), jnp.bfloat16).at[:, :n_class].set(
        w3.astype(jnp.bfloat16))
    b1_f = b1.reshape(1, H1).astype(jnp.float32)
    b2_f = b2.reshape(1, H2).astype(jnp.float32)
    b3_f = jnp.zeros((1, N_PAD), jnp.float32).at[:, :n_class].set(
        b3.reshape(1, n_class).astype(jnp.float32))

    # ---- cost estimate (advisory for XLA scheduling) ----
    flops = 2 * B_pad * (K_IN * H1 + H1 * H2 + H2 * N_PAD)
    bytes_accessed = (
        B_pad * K_IN * 4                                   # x (f32, read once)
        + (K_IN * H1 + H1 * H2 + H2 * N_PAD) * 2           # weights (bf16)
        + (H1 + H2 + N_PAD) * 4                            # biases (f32)
        + B_pad * N_PAD * 4                                # output (f32)
    )
    cost = pl.CostEstimate(flops=flops, transcendentals=0,
                           bytes_accessed=bytes_accessed)

    out = pl.pallas_call(
        mlp_kernel,
        out_shape=jax.ShapeDtypeStruct((B_pad, N_PAD), jnp.float32),
        grid=grid,
        in_specs=[
            pl.BlockSpec((TB, K_IN), lambda i: (i, 0)),     # x tile (pipelined)
            pl.BlockSpec((K_IN, H1), lambda i: (0, 0)),     # w1 (VMEM-resident)
            pl.BlockSpec((1, H1),    lambda i: (0, 0)),     # b1
            pl.BlockSpec((H1, H2),   lambda i: (0, 0)),     # w2
            pl.BlockSpec((1, H2),    lambda i: (0, 0)),     # b2
            pl.BlockSpec((H2, N_PAD), lambda i: (0, 0)),    # w3 (lane-padded)
            pl.BlockSpec((1, N_PAD), lambda i: (0, 0)),     # b3 (lane-padded)
        ],
        out_specs=pl.BlockSpec((TB, N_PAD), lambda i: (i, 0)),
        compiler_params=pltpu.CompilerParams(
            dimension_semantics=("parallel",),
            vmem_limit_bytes=32 * 1024 * 1024,
        ),
        cost_estimate=cost,
    )(x2d, w1_b, b1_f, w2_b, b2_f, w3_b, b3_f)

    return out[:B, :n_class]


def init_params(key, n_class, hidden_size=(128, 128)):
    """Deterministic init mimicking nn.Linear's default U(-1/sqrt(fan_in), 1/sqrt(fan_in))."""
    dims = [(K_IN, hidden_size[0]),
            (hidden_size[0], hidden_size[1]),
            (hidden_size[1], n_class)]
    params = []
    for (fan_in, fan_out) in dims:
        key, kw, kb = jax.random.split(key, 3)
        bound = 1.0 / jnp.sqrt(float(fan_in))
        # stored as (in, out) == torch_weight.T
        w = jax.random.uniform(kw, (fan_in, fan_out), jnp.float32, -bound, bound)
        b = jax.random.uniform(kb, (1, fan_out), jnp.float32, -bound, bound)
        params += [w, b]
    return tuple(params)


def mlp_ref(x, params):
    """Plain-JAX f32 reference for correctness check."""
    w1, b1, w2, b2, w3, b3 = params
    h = x.reshape(x.shape[0], -1)
    h = jax.nn.leaky_relu(h @ w1 + b1, NEG_SLOPE)
    h = jax.nn.leaky_relu(h @ w2 + b2, NEG_SLOPE)
    return h @ w3 + b3


if __name__ == "__main__":
    key = jax.random.PRNGKey(0)
    n_class = 10
    params = init_params(key, n_class)

    kx = jax.random.fold_in(key, 7)
    x = jax.random.normal(kx, (2, 1, 28, 28), jnp.float32)  # small MNIST-like NCHW batch

    out = mlp_forward(x, params)
    out = jax.block_until_ready(out)

    ref = mlp_ref(x, params)
    assert out.shape == (2, n_class)
    # bf16 MXU inputs (f32 accumulation) -> loosened tolerance vs the f32 reference.
    assert jnp.allclose(out, ref, atol=5e-2, rtol=5e-2), "mismatch vs reference"

    print("KERNEL_OK")
</pallas_src>

<mosaic_0001>
module attributes {stable_mosaic.version = 11 : i64} {
  func.func @mlp_kernel(%arg0: i32, %arg1: memref<8x784xf32, #tpu.memory_space<vmem>>, %arg2: memref<784x128xbf16, #tpu.memory_space<vmem>>, %arg3: memref<1x128xf32, #tpu.memory_space<vmem>>, %arg4: memref<128x128xbf16, #tpu.memory_space<vmem>>, %arg5: memref<1x128xf32, #tpu.memory_space<vmem>>, %arg6: memref<128x128xbf16, #tpu.memory_space<vmem>>, %arg7: memref<1x128xf32, #tpu.memory_space<vmem>>, %arg8: memref<8x128xf32, #tpu.memory_space<vmem>>) attributes {dimension_semantics = [#tpu.dimension_semantics<parallel>], iteration_bounds = array<i64: 1>, scalar_prefetch = 0 : i64, scratch_operands = 0 : i64, tpu.core_type = #tpu.core_type<tc>, window_params = [{transform_indices = @transform_0, window_bounds = array<i64: 8, 784>}, {pipeline_mode = #tpu.pipeline_mode<synchronous>, transform_indices = @transform_1, window_bounds = array<i64: 784, 128>}, {pipeline_mode = #tpu.pipeline_mode<synchronous>, transform_indices = @transform_2, window_bounds = array<i64: 1, 128>}, {pipeline_mode = #tpu.pipeline_mode<synchronous>, transform_indices = @transform_3, window_bounds = array<i64: 128, 128>}, {pipeline_mode = #tpu.pipeline_mode<synchronous>, transform_indices = @transform_4, window_bounds = array<i64: 1, 128>}, {pipeline_mode = #tpu.pipeline_mode<synchronous>, transform_indices = @transform_5, window_bounds = array<i64: 128, 128>}, {pipeline_mode = #tpu.pipeline_mode<synchronous>, transform_indices = @transform_6, window_bounds = array<i64: 1, 128>}, {transform_indices = @transform_7, window_bounds = array<i64: 8, 128>}]} {
    %c0 = arith.constant 0 : index
    %c0_0 = arith.constant 0 : index
    %0 = vector.load %arg1[%c0, %c0_0] : memref<8x784xf32, #tpu.memory_space<vmem>>, vector<8x784xf32>
    %1 = arith.truncf %0 : vector<8x784xf32> to vector<8x784xbf16>
    %c0_1 = arith.constant 0 : index
    %c0_2 = arith.constant 0 : index
    %2 = vector.load %arg2[%c0_1, %c0_2] : memref<784x128xbf16, #tpu.memory_space<vmem>>, vector<784x128xbf16>
    %cst = arith.constant dense<0.000000e+00> : vector<8x128xf32>
    %3 = tpu.matmul %1, %2, %cst {dimension_numbers = #tpu.dot_dimension_numbers<[1], [0], [0], [1], [0, 0, 1, 1], [], []>} : vector<8x784xbf16>, vector<784x128xbf16>, vector<8x128xf32> -> vector<8x128xf32>
    %c0_3 = arith.constant 0 : index
    %c0_4 = arith.constant 0 : index
    %4 = vector.load %arg3[%c0_3, %c0_4] : memref<1x128xf32, #tpu.memory_space<vmem>>, vector<1x128xf32>
    %5 = vector.broadcast %4 : vector<1x128xf32> to vector<8x128xf32>
    %6 = arith.addf %3, %5 : vector<8x128xf32>
    %cst_5 = arith.constant 0.000000e+00 : f32
    %7 = vector.broadcast %cst_5 : f32 to vector<8x128xf32>
    %8 = arith.cmpf ogt, %6, %7 : vector<8x128xf32>
    %cst_6 = arith.constant 0.00999999977 : f32
    %9 = vector.broadcast %cst_6 : f32 to vector<8x128xf32>
    %10 = arith.mulf %9, %6 : vector<8x128xf32>
    %11 = arith.select %8, %6, %10 : vector<8x128xi1>, vector<8x128xf32>
    %12 = arith.truncf %11 : vector<8x128xf32> to vector<8x128xbf16>
    %c0_7 = arith.constant 0 : index
    %c0_8 = arith.constant 0 : index
    %13 = vector.load %arg4[%c0_7, %c0_8] : memref<128x128xbf16, #tpu.memory_space<vmem>>, vector<128x128xbf16>
    %cst_9 = arith.constant dense<0.000000e+00> : vector<8x128xf32>
    %14 = tpu.matmul %12, %13, %cst_9 {dimension_numbers = #tpu.dot_dimension_numbers<[1], [0], [0], [1], [0, 0, 1, 1], [], []>} : vector<8x128xbf16>, vector<128x128xbf16>, vector<8x128xf32> -> vector<8x128xf32>
    %c0_10 = arith.constant 0 : index
    %c0_11 = arith.constant 0 : index
    %15 = vector.load %arg5[%c0_10, %c0_11] : memref<1x128xf32, #tpu.memory_space<vmem>>, vector<1x128xf32>
    %16 = vector.broadcast %15 : vector<1x128xf32> to vector<8x128xf32>
    %17 = arith.addf %14, %16 : vector<8x128xf32>
    %cst_12 = arith.constant 0.000000e+00 : f32
    %18 = vector.broadcast %cst_12 : f32 to vector<8x128xf32>
    %19 = arith.cmpf ogt, %17, %18 : vector<8x128xf32>
    %cst_13 = arith.constant 0.00999999977 : f32
    %20 = vector.broadcast %cst_13 : f32 to vector<8x128xf32>
    %21 = arith.mulf %20, %17 : vector<8x128xf32>
    %22 = arith.select %19, %17, %21 : vector<8x128xi1>, vector<8x128xf32>
    %23 = arith.truncf %22 : vector<8x128xf32> to vector<8x128xbf16>
    %c0_14 = arith.constant 0 : index
    %c0_15 = arith.constant 0 : index
    %24 = vector.load %arg6[%c0_14, %c0_15] : memref<128x128xbf16, #tpu.memory_space<vmem>>, vector<128x128xbf16>
    %cst_16 = arith.constant dense<0.000000e+00> : vector<8x128xf32>
    %25 = tpu.matmul %23, %24, %cst_16 {dimension_numbers = #tpu.dot_dimension_numbers<[1], [0], [0], [1], [0, 0, 1, 1], [], []>} : vector<8x128xbf16>, vector<128x128xbf16>, vector<8x128xf32> -> vector<8x128xf32>
    %c0_17 = arith.constant 0 : index
    %c0_18 = arith.constant 0 : index
    %26 = vector.load %arg7[%c0_17, %c0_18] : memref<1x128xf32, #tpu.memory_space<vmem>>, vector<1x128xf32>
    %27 = vector.broadcast %26 : vector<1x128xf32> to vector<8x128xf32>
    %28 = arith.addf %25, %27 : vector<8x128xf32>
    %c0_19 = arith.constant 0 : index
    %c0_20 = arith.constant 0 : index
    %29 = vector.load %arg8[%c0_19, %c0_20] : memref<8x128xf32, #tpu.memory_space<vmem>>, vector<8x128xf32>
    tpu.vector_store %arg8[%c0_19, %c0_20], %28 {strides = array<i32>} : memref<8x128xf32, #tpu.memory_space<vmem>>, vector<8x128xf32>,
    return
  }
  func.func @transform_0(%arg0: i32) -> (i32, i32) {
    %c0_i32 = arith.constant 0 : i32
    %c0_i32_0 = arith.constant 0 : i32
    return %arg0, %c0_i32 : i32, i32
  }
  func.func @transform_1(%arg0: i32) -> (i32, i32) {
    %c0_i32 = arith.constant 0 : i32
    %c0_i32_0 = arith.constant 0 : i32
    %c0_i32_1 = arith.constant 0 : i32
    return %c0_i32, %c0_i32_0 : i32, i32
  }
  func.func @transform_2(%arg0: i32) -> (i32, i32) {
    %c0_i32 = arith.constant 0 : i32
    %c0_i32_0 = arith.constant 0 : i32
    %c0_i32_1 = arith.constant 0 : i32
    return %c0_i32, %c0_i32_0 : i32, i32
  }
  func.func @transform_3(%arg0: i32) -> (i32, i32) {
    %c0_i32 = arith.constant 0 : i32
    %c0_i32_0 = arith.constant 0 : i32
    %c0_i32_1 = arith.constant 0 : i32
    return %c0_i32, %c0_i32_0 : i32, i32
  }
  func.func @transform_4(%arg0: i32) -> (i32, i32) {
    %c0_i32 = arith.constant 0 : i32
    %c0_i32_0 = arith.constant 0 : i32
    %c0_i32_1 = arith.constant 0 : i32
    return %c0_i32, %c0_i32_0 : i32, i32
  }
  func.func @transform_5(%arg0: i32) -> (i32, i32) {
    %c0_i32 = arith.constant 0 : i32
    %c0_i32_0 = arith.constant 0 : i32
    %c0_i32_1 = arith.constant 0 : i32
    return %c0_i32, %c0_i32_0 : i32, i32
  }
  func.func @transform_6(%arg0: i32) -> (i32, i32) {
    %c0_i32 = arith.constant 0 : i32
    %c0_i32_0 = arith.constant 0 : i32
    %c0_i32_1 = arith.constant 0 : i32
    return %c0_i32, %c0_i32_0 : i32, i32
  }
  func.func @transform_7(%arg0: i32) -> (i32, i32) {
    %c0_i32 = arith.constant 0 : i32
    %c0_i32_0 = arith.constant 0 : i32
    return %arg0, %c0_i32 : i32, i32
  }
}

</mosaic_0001>

<bundles_post_ra>
// kernel: tpu_custom_call.1
= control target key start
LH: loop header
LB: loop body
LE: loop exit
PB: predicated region body
PF: predicated region fallthrough
CT: control target
= control target key end

     0   :  { %12 = vsyncpa [#allocation3], 0  ;;  %s1319_s0 = inlined_call_operand.hbm [shape: f32[8,784], index: 0, kind: input, shape index: {}]   ;;  %s1320_s1 = inlined_call_operand.hbm [shape: bf16[784,128], index: 1, kind: input, shape index: {}]   ;;  %s1321_s2 = inlined_call_operand.vmem [shape: f32[1,128], index: 2, kind: input, shape index: {}]   ;;  %s1322_s3 = inlined_call_operand.hbm [shape: bf16[128,128], index: 3, kind: input, shape index: {}]   ;;  %s1323_s4 = inlined_call_operand.vmem [shape: f32[1,128], index: 4, kind: input, shape index: {}]   ;;  %s1324_s5 = inlined_call_operand.hbm [shape: bf16[128,128], index: 5, kind: input, shape index: {}]   ;;  %s1325_s6 = inlined_call_operand.vmem [shape: f32[1,128], index: 6, kind: input, shape index: {}]   ;;  %s1326_s7 = inlined_call_operand.hbm [shape: f32[8,128], index: 7, kind: output, shape index: {}]  }
   0x1   :  { %13 = vsyncpa [#allocation6], 0 }
   0x2   :  { %14 = vsyncpa [#allocation9], 0  ;;  %s31_s26 = sshll.u32 %s1320_s1, 4  ;;  %s32_s26 = int_to_ptr.hbm [resolvable:$true] %s31_s26 }
   0x3   :  { %15 = vsyncpa [#allocation4], 0  ;;  %s1248_s27 = smov [#allocation5]   ;;  %s21_s8 = sshll.u32 %s1319_s0, 4  ;;  %s22_s8 = int_to_ptr.hbm [resolvable:$true] %s21_s8 }
   0x4   :  { %s33_s28 = sshll.u32 %s1248_s27, 4  ;;  %s1249_s9 = smov 64   ;;  %s34_s28 = int_to_ptr.vmem [resolvable:$true] %s33_s28 }
   0x5   :  { %s1250_s10 = smov 4   ;;  %s1251_s11 = smov [#allocation2]  }
   0x6   :  { %39 = dma.hbm_to_vmem [thread:$0]  %s32_s26, 6272, %s34_s28, [#allocation6], %s1249_s9, %s1249_s9, %s1250_s10  }
   0x7   :  { %s23_s12 = sshll.u32 %s1251_s11, 4  ;;  %s46_s15 = sshll.u32 %s1322_s3, 4  ;;  %s24_s12 = int_to_ptr.vmem [resolvable:$true] %s23_s12  ;;  %s47_s15 = int_to_ptr.hbm [resolvable:$true] %s46_s15 }
   0x8   :  { %26 = dma.hbm_to_vmem [thread:$0]  %s22_s8, 896, %s24_s12, [#allocation3]  }
   0x9   :  { %s61_s17 = sshll.u32 %s1324_s5, 4  ;;  %s1252_s18 = smov [#allocation7]   ;;  %s62_s17 = int_to_ptr.hbm [resolvable:$true] %s61_s17 }
   0xa   :  { %s48_s19 = sshll.u32 %s1252_s18, 4  ;;  %s1253_s0 = smov [#allocation8]   ;;  %s49_s19 = int_to_ptr.vmem [resolvable:$true] %s48_s19 }
   0xb   :  { %54 = dma.hbm_to_vmem [thread:$0]  %s47_s15, 1024, %s49_s19, [#allocation6], %s1249_s9, %s1249_s9, %s1250_s10  }
   0xc   :  { %s63_s20 = sshll.u32 %s1253_s0, 4  ;;  %s64_s20 = int_to_ptr.vmem [resolvable:$true] %s63_s20 }
   0xd   :  { %69 = dma.hbm_to_vmem [thread:$0]  %s62_s17, 1024, %s64_s20, [#allocation9], %s1249_s9, %s1249_s9, %s1250_s10  }
   0xe   :  { %1240 = dma.done.wait [#allocation3], 896  }
   0xf   :  { %1241 = vsyncadd [#allocation3], 4294966400 }
  0x10   :  { %1242 = dma.done.wait [#allocation6], 7296  }
  0x11   :  { %1243 = vsyncadd [#allocation6], 4294960000 }
  0x12   :  { %1244 = dma.done.wait [#allocation9], 1024  }
  0x13   :  { %1245 = vsyncadd [#allocation9], 4294966272  ;;  %v1052_v0 = vld [vmem:[#allocation5 + $0x38] sm:$0xff]  ;;  %v1051_v3 = vld [vmem:[#allocation5 + $0x30] sm:$0xff]  ;;  %vm499_vm0 = vcmask 130048   ;;  %s1254_s24 = smov [#allocation10]  }
  0x14   :  { %v1060_v1 = vld [vmem:[#allocation5 + $0x78] sm:$0xff]  ;;  %503 = vmatpush.bf16.msra.mxu0 %v1052_v0  ;;  %v1059_v4 = vld [vmem:[#allocation5 + $0x70] sm:$0xff]  ;;  %v1050_v8 = vld [vmem:[#allocation5 + $0x28] sm:$0xff]  ;;  %s770_s25 = sshll.u32 %s1254_s24, 4  ;;  %s772_s28 = sshll.u32 %s1326_s7, 4  ;;  %s771_s25 = int_to_ptr.vmem [resolvable:$true] %s770_s25  ;;  %s773_s28 = int_to_ptr.hbm [resolvable:$true] %s772_s28 }
  0x15   :  { %v1068_v2 = vld [vmem:[#allocation5 + $0xb8] sm:$0xff]  ;;  %516 = vmatpush.bf16.msra.mxu1 %v1060_v1  ;;  %v1067_v5 = vld [vmem:[#allocation5 + $0xb0] sm:$0xff]  ;;  %v1058_v9 = vld [vmem:[#allocation5 + $0x68] sm:$0xff] }
  0x16   :  { %529 = vmatpush.bf16.msra.mxu2 %v1068_v2  ;;  %v1076_v6 = vld [vmem:[#allocation5 + $0xf8] sm:$0xff]  ;;  %v1075_v7 = vld [vmem:[#allocation5 + $0xf0] sm:$0xff]  ;;  %v1066_v10 = vld [vmem:[#allocation5 + $0xa8] sm:$0xff] }
  0x17   :  { %542 = vmatpush.bf16.msra.mxu3 %v1076_v6  ;;  %v1074_v11 = vld [vmem:[#allocation5 + $0xe8] sm:$0xff]  ;;  %v1049_v12 = vld [vmem:[#allocation5 + $0x20] sm:$0xff]  ;;  %v1048_v16 = vld [vmem:[#allocation5 + $0x18] sm:$0xff] }
  0x18   :  { %504 = vmatpush.bf16.msra.mxu0 %v1051_v3  ;;  %v1057_v13 = vld [vmem:[#allocation5 + $0x60] sm:$0xff]  ;;  %v1056_v17 = vld [vmem:[#allocation5 + $0x58] sm:$0xff]  ;;  %v1047_v20 = vld [vmem:[#allocation5 + $0x10] sm:$0xff] }
  0x19   :  { %517 = vmatpush.bf16.msra.mxu1 %v1059_v4  ;;  %v1065_v14 = vld [vmem:[#allocation5 + $0xa0] sm:$0xff]  ;;  %v1064_v18 = vld [vmem:[#allocation5 + $0x98] sm:$0xff]  ;;  %v1055_v21 = vld [vmem:[#allocation5 + $0x50] sm:$0xff] }
  0x1a   :  { %530 = vmatpush.bf16.msra.mxu2 %v1067_v5  ;;  %v1073_v15 = vld [vmem:[#allocation5 + $0xe0] sm:$0xff]  ;;  %v1072_v19 = vld [vmem:[#allocation5 + $0xd8] sm:$0xff]  ;;  %v1063_v22 = vld [vmem:[#allocation5 + $0x90] sm:$0xff] }
  0x1b   :  { %543 = vmatpush.bf16.msra.mxu3 %v1075_v7  ;;  %v1071_v23 = vld [vmem:[#allocation5 + $0xd0] sm:$0xff]  ;;  %v1046_v24 = vld [vmem:[#allocation5 + $0x8] sm:$0xff]  ;;  %v1045_v27 = vld [vmem:[#allocation5] sm:$0xff] }
  0x1c   :  { %505 = vmatpush.bf16.msra.mxu0 %v1050_v8  ;;  %v1054_v25 = vld [vmem:[#allocation5 + $0x48] sm:$0xff]  ;;  %v1053_v29 = vld [vmem:[#allocation5 + $0x40] sm:$0xff]  ;;  %v90_v31 = vld [vmem:[#allocation2 + $0x8] sm:$0xff] }
  0x1d   :  { %518 = vmatpush.bf16.msra.mxu1 %v1058_v9  ;;  %v1062_v26 = vld [vmem:[#allocation5 + $0x88] sm:$0xff]  ;;  %v1084_v32 = vld [vmem:[#allocation5 + $0x138] sm:$0xff]  ;;  %v1061_v34 = vld [vmem:[#allocation5 + $0x80] sm:$0xff]  ;;  %v97_v37 = vpack.c.bf16 %v90_v31, %v90_v31 }
  0x1e   :  { %531 = vmatpush.bf16.msra.mxu2 %v1066_v10  ;;  %v1070_v28 = vld [vmem:[#allocation5 + $0xc8] sm:$0xff]  ;;  %v1092_v33 = vld [vmem:[#allocation5 + $0x178] sm:$0xff]  ;;  %v1069_v38 = vld [vmem:[#allocation5 + $0xc0] sm:$0xff] }
  0x1f   :  { %544 = vmatpush.bf16.msra.mxu3 %v1074_v11  ;;  %v89_v30 = vld [vmem:[#allocation2] sm:$0xff]  ;;  %v91_v35 = vld [vmem:[#allocation2 + $0x10] sm:$0xff]  ;;  %v1093_v39 = vld [vmem:[#allocation5 + $0x180] sm:$0xff] }
  0x20   :  { %506 = vmatpush.bf16.msra.mxu0 %v1049_v12  ;;  %v96_v36 = vpack.c.bf16 %v89_v30, %v89_v30  ;;  %v92_v40 = vld [vmem:[#allocation2 + $0x18] sm:$0xff]  ;;  %v1083_v41 = vld [vmem:[#allocation5 + $0x130] sm:$0xff]  ;;  %v98_v43 = vpack.c.bf16 %v91_v35, %v91_v35  ;;  %v1082_v45 = vld [vmem:[#allocation5 + $0x128] sm:$0xff] }
  0x21   :  { %519 = vmatpush.bf16.msra.mxu1 %v1057_v13  ;;  %v1091_v42 = vld [vmem:[#allocation5 + $0x170] sm:$0xff]  ;;  %v99_v44 = vpack.c.bf16 %v92_v40, %v92_v40  ;;  %v1090_v46 = vld [vmem:[#allocation5 + $0x168] sm:$0xff]  ;;  %v1081_v47 = vld [vmem:[#allocation5 + $0x120] sm:$0xff] }
  0x22   :  { %532 = vmatpush.bf16.msra.mxu2 %v1065_v14  ;;  %v1089_v48 = vld [vmem:[#allocation5 + $0x160] sm:$0xff]  ;;  %v1080_v49 = vld [vmem:[#allocation5 + $0x118] sm:$0xff]  ;;  %v1079_v52 = vld [vmem:[#allocation5 + $0x110] sm:$0xff] }
  0x23   :  { %545 = vmatpush.bf16.msra.mxu3 %v1073_v15  ;;  %v1088_v50 = vld [vmem:[#allocation5 + $0x158] sm:$0xff]  ;;  %v1087_v53 = vld [vmem:[#allocation5 + $0x150] sm:$0xff]  ;;  %v1078_v55 = vld [vmem:[#allocation5 + $0x108] sm:$0xff] }
  0x24   :  { %507 = vmatpush.bf16.msra.mxu0 %v1048_v16  ;;  %v95_v51 = vld [vmem:[#allocation2 + $0x30] sm:$0xff]  ;;  %v1086_v56 = vld [vmem:[#allocation5 + $0x148] sm:$0xff]  ;;  %v1077_v57 = vld [vmem:[#allocation5 + $0x100] sm:$0xff] }
  0x25   :  { %520 = vmatpush.bf16.msra.mxu1 %v1056_v17  ;;  %v102_v54 = vpack.c.bf16 %v95_v51, %v95_v51  ;;  %v1085_v58 = vld [vmem:[#allocation5 + $0x140] sm:$0xff]  ;;  %v93_v59 = vld [vmem:[#allocation2 + $0x20] sm:$0xff]  ;;  %v94_v60 = vld [vmem:[#allocation2 + $0x28] sm:$0xff] }
  0x26   :  { %533 = vmatpush.bf16.msra.mxu2 %v1064_v18  ;;  %v100_v61 = vpack.c.bf16 %v93_v59, %v93_v59  ;;  %v101_v62 = vpack.c.bf16 %v94_v60, %v94_v60  ;;  %v1101_v63 = vld [vmem:[#allocation7 + $0x38] sm:$0xff]  ;;  %v1100_v0 = vld [vmem:[#allocation7 + $0x30] sm:$0xff]  ;;  %v1099_v1 = vld [vmem:[#allocation7 + $0x28] sm:$0xff] }
  0x27   :  { %546 = vmatpush.bf16.msra.mxu3 %v1072_v19  ;;  %v1098_v2 = vld [vmem:[#allocation7 + $0x20] sm:$0xff]  ;;  %v1097_v3 = vld [vmem:[#allocation7 + $0x18] sm:$0xff]  ;;  %v1096_v4 = vld [vmem:[#allocation7 + $0x10] sm:$0xff] }
  0x28   :  { %508 = vmatpush.bf16.msra.mxu0 %v1047_v20  ;;  %v1095_v7 = vld [vmem:[#allocation7 + $0x8] sm:$0xff]  ;;  %v1094_v8 = vld [vmem:[#allocation7] sm:$0xff]  ;;  %v1109_v12 = vld [vmem:[#allocation8 + $0x38] sm:$0xff] }
  0x29   :  { %521 = vmatpush.bf16.msra.mxu1 %v1055_v21  ;;  %v1108_v14 = vld [vmem:[#allocation8 + $0x30] sm:$0xff]  ;;  %v1117_v15 = vld [vmem:[%s1321_s2] ss:$0 sm:$0xff]  ;;  %v1107_v16 = vld [vmem:[#allocation8 + $0x28] sm:$0xff] }
  0x2a   :  { %534 = vmatpush.bf16.msra.mxu2 %v1063_v22  ;;  %v1106_v20 = vld [vmem:[#allocation8 + $0x20] sm:$0xff]  ;;  %v1105_v22 = vld [vmem:[#allocation8 + $0x18] sm:$0xff] }
  0x2b   :  { %547 = vmatpush.bf16.msra.mxu3 %v1071_v23  ;;  %v1118_v40 = vld [vmem:[%s1323_s4] ss:$0 sm:$0xff] }
  0x2c   :  { %509 = vmatpush.bf16.msra.mxu0 %v1046_v24 }
  0x2d   :  { %522 = vmatpush.bf16.msra.mxu1 %v1054_v25  ;;  %v1104_v25 = vld [vmem:[#allocation8 + $0x10] sm:$0xff] }
  0x2e   :  { %535 = vmatpush.bf16.msra.mxu2 %v1062_v26 }
  0x2f   :  { %548 = vmatpush.bf16.msra.mxu3 %v1070_v28 }
  0x30   :  { %510 = vmatpush.bf16.msra.mxu0 %v1045_v27 }
  0x31   :  { %523 = vmatpush.bf16.msra.mxu1 %v1053_v29 }
  0x32   :  { %536 = vmatpush.bf16.msra.mxu2 %v1061_v34 }
  0x33   :  { %511 = vmatmul.bf16.vlgmr.msra.gmra.mxu0 %v96_v36  ;;  %549 = vmatpush.bf16.msra.mxu3 %v1069_v38  ;;  %v1103_v38 = vld [vmem:[#allocation8 + $0x8] sm:$0xff] }
  0x34   :  { %555 = vmatpush.bf16.msrb.mxu0 %v1084_v32  ;;  %524 = vmatmul.bf16.vlgmr.msra.gmra.mxu1 %v97_v37 }
  0x35   :  { %568 = vmatpush.bf16.msrb.mxu1 %v1092_v33  ;;  %537 = vmatmul.bf16.vlgmr.msra.gmra.mxu2 %v98_v43 }
  0x36   :  { %588 = vmatpush.bf16.msrb.mxu2 %v1093_v39  ;;  %550 = vmatmul.bf16.vlgmr.msra.gmra.mxu3 %v99_v44  ;;  %v1102_v39 = vld [vmem:[#allocation8] sm:$0xff] }
  0x37   :  { %666 = vmatpush.bf16.msrb.mxu3 %v1101_v63 }
  0x38   :  { %556 = vmatpush.bf16.msrb.mxu0 %v1083_v41 }
  0x39   :  { %569 = vmatpush.bf16.msrb.mxu1 %v1091_v42 }
  0x3a   :  { %751 = vmatpush.bf16.msra.mxu2 %v1109_v12 }
  0x3b   :  { %667 = vmatpush.bf16.msrb.mxu3 %v1100_v0 }
  0x3c   :  { %557 = vmatpush.bf16.msrb.mxu0 %v1082_v45 }
  0x3d   :  { %570 = vmatpush.bf16.msrb.mxu1 %v1090_v46 }
  0x3e   :  { %752 = vmatpush.bf16.msra.mxu2 %v1108_v14 }
  0x3f   :  { %668 = vmatpush.bf16.msrb.mxu3 %v1099_v1 }
  0x40   :  { %558 = vmatpush.bf16.msrb.mxu0 %v1081_v47  ;;  %v1119_v47 = vld [vmem:[%s1325_s6] ss:$0 sm:$0xff] }
  0x41   :  { %571 = vmatpush.bf16.msrb.mxu1 %v1089_v48 }
  0x42   :  { %753 = vmatpush.bf16.msra.mxu2 %v1107_v16 }
  0x43   :  { %669 = vmatpush.bf16.msrb.mxu3 %v1098_v2 }
  0x44   :  { %559 = vmatpush.bf16.msrb.mxu0 %v1080_v49 }
  0x45   :  { %572 = vmatpush.bf16.msrb.mxu1 %v1088_v50  ;;  %980 = vmatmul.msk.bf16.vlgmr.msrb.gmra.mxu2 %vm499_vm0, %v102_v54 }
  0x46   :  { %754 = vmatpush.bf16.msra.mxu2 %v1106_v20 }
  0x47   :  { %670 = vmatpush.bf16.msrb.mxu3 %v1097_v3 }
  0x48   :  { %560 = vmatpush.bf16.msrb.mxu0 %v1079_v52 }
  0x49   :  { %573 = vmatpush.bf16.msrb.mxu1 %v1087_v53 }
  0x4a   :  { %755 = vmatpush.bf16.msra.mxu2 %v1105_v22 }
  0x4b   :  { %671 = vmatpush.bf16.msrb.mxu3 %v1096_v4 }
  0x4c   :  { %561 = vmatpush.bf16.msrb.mxu0 %v1078_v55 }
  0x4d   :  { %574 = vmatpush.bf16.msrb.mxu1 %v1086_v56 }
  0x4e   :  { %756 = vmatpush.bf16.msra.mxu2 %v1104_v25 }
  0x4f   :  { %672 = vmatpush.bf16.msrb.mxu3 %v1095_v7 }
  0x50   :  { %562 = vmatpush.bf16.msrb.mxu0 %v1077_v57 }
  0x51   :  { %575 = vmatpush.bf16.msrb.mxu1 %v1085_v58 }
  0x52   :  { %757 = vmatpush.bf16.msra.mxu2 %v1103_v38 }
  0x53   :  { %563 = vmatmul.bf16.vlgmr.msrb.gmra.mxu0 %v100_v61  ;;  %673 = vmatpush.bf16.msrb.mxu3 %v1094_v8 }
  0x54   :  { %576 = vmatmul.bf16.vlgmr.msrb.gmra.mxu1 %v101_v62 }
  0x56   :  { %758 = vmatpush.bf16.msra.mxu2 %v1102_v39 }
  0xb0   :  { %v512_v5 = vpop.f32.mrf.mxu0 }
  0xb1   :  { %v525_v6 = vpop.f32.mrf.mxu1  ;;  %v513_v17 = vadd.f32 %v1117_v15, %v512_v5 }
  0xb3   :  { %v526_v21 = vadd.f32 %v525_v6, %v513_v17 }
  0xb8   :  { %v514_v9 = vpop.f32.mrf.mxu0  ;;  %v538_v11 = vpop.f32.mrf.mxu2 }
  0xb9   :  { %v527_v10 = vpop.f32.mrf.mxu1  ;;  %v551_v13 = vpop.f32.mrf.mxu3  ;;  %v539_v23 = vadd.f32 %v538_v11, %v526_v21 }
  0xbb   :  { %v552_v26 = vadd.f32 %v551_v13, %v539_v23 }
  0xc0   :  { %v540_v18 = vpop.f32.mrf.mxu2 }
  0xc1   :  { %v553_v19 = vpop.f32.mrf.mxu3 }
  0xc8   :  { %v590_v24 = vpop.f32.mrf.mxu2 }
  0xd0   :  { %v564_v27 = vpop.f32.mrf.mxu0  ;;  %v592_v31 = vpop.f32.mrf.mxu2 }
  0xd1   :  { %v577_v28 = vpop.f32.mrf.mxu1  ;;  %v565_v29 = vadd.f32 %v564_v27, %v552_v26 }
  0xd3   :  { %v578_v30 = vadd.f32 %v577_v28, %v565_v29 }
  0xd5   :  { %v591_v32 = vadd.f32 %v590_v24, %v578_v30 }
  0xd7   :  { %v595_v33 = vmul.f32 0.01, %v591_v32  ;;  %vm594_vm1 = vcmp.gt.f32.partialorder %v591_v32, 0.0 }
  0xd8   :  { %v566_v34 = vpop.f32.mrf.mxu0 }
  0xd9   :  { %v579_v35 = vpop.f32.mrf.mxu1  ;;  %v596_v36 = vsel %vm594_vm1, %v591_v32, %v595_v33 }
  0xda   :  { %v597_v37 = vpack.c.bf16 %v596_v36, %v596_v36 }
  0xdc   :  { %674 = vmatmul.bf16.vlgmr.msrb.gmra.mxu3 %v597_v37 }
 0x15f   :  { %v675_v41 = vpop.f32.mrf.mxu3 }
 0x160   :  { %v676_v42 = vadd.f32 %v1118_v40, %v675_v41 }
 0x162   :  { %vm679_vm2 = vcmp.gt.f32.partialorder %v676_v42, 0.0  ;;  %v680_v43 = vmul.f32 0.01, %v676_v42 }
 0x164   :  { %v681_v44 = vsel %vm679_vm2, %v676_v42, %v680_v43 }
 0x165   :  { %v682_v45 = vpack.c.bf16 %v681_v44, %v681_v44 }
 0x167   :  { %v677_v46 = vpop.f32.mrf.mxu3  ;;  %759 = vmatmul.bf16.vlgmr.msra.gmra.mxu2 %v682_v45 }
 0x1ea   :  { %v760_v48 = vpop.f32.mrf.mxu2 }
 0x1eb   :  { %v761_v49 = vadd.f32 %v1119_v47, %v760_v48 }
 0x1ed   :  { %764 = vst [vmem:[#allocation10] sm:$0xff] %v761_v49 }
 0x1ee   :  { %775 = dma.vmem_to_hbm [thread:$0]  %s771_s25, 128, %s773_s28, [#allocation4]  }
 0x1f2   :  { %v762_v50 = vpop.f32.mrf.mxu2 }
 0x1f3   :  { %1246 = dma.done.wait [#allocation4], 128  }
 0x1f4   :  { %1247 = vsyncadd [#allocation4], 4294967168 }
 0x1f5   :  { %780 = vsyncpa [#allocation3], 1 }
 0x1f6   :  { %781 = vsyncpa [#allocation6], 1 }
 0x1f7   :  { %782 = vsyncpa [#allocation9], 1 }
 0x1f8   :  { %783 = vsyncpa [#allocation4], 1 }

</bundles_post_ra>
